<compile_context>
chip_gen: v5e
topology: v5e:2x2
jax: 0.10.0
libtpu: 0.0.40
codegen_flags: <defaults>
</compile_context>

<pallas_src>
import functools

import jax
import jax.numpy as jnp
from jax.experimental import pallas as pl
from jax.experimental.pallas import tpu as pltpu

LANE = 128          # TPU lane width; output dim is padded to this
_NEG_BIG = -1e30    # bias for padded output lanes -> exp() == 0 under softmax


def _round_up(x: int, m: int) -> int:
    return ((x + m - 1) // m) * m


def mlp_kernel(x_ref, w1_ref, b1_ref, w2_ref, b2_ref, o_ref):
    # Hidden layer: Linear + ReLU. bf16 MXU inputs, f32 accumulation.
    h = jnp.dot(x_ref[...], w1_ref[...], preferred_element_type=jnp.float32)
    h = jnp.maximum(h + b1_ref[...], 0.0)            # (TB, H) + (1, H), f32

    # Output layer on lane-padded (H, 128) weights. Padded columns have zero
    # weights and a -1e30 bias, so they contribute nothing to the softmax.
    z = jnp.dot(h.astype(w2_ref.dtype), w2_ref[...],
                preferred_element_type=jnp.float32)
    z = z + b2_ref[...]                              # (TB, 128) + (1, 128)

    # Numerically stable softmax over the (padded) last dim, all in f32.
    z = z - jnp.max(z, axis=-1, keepdims=True)
    e = jnp.exp(z)
    inv = pl.reciprocal(jnp.sum(e, axis=-1, keepdims=True), approx=True)
    o_ref[...] = (e * inv).astype(o_ref.dtype)


def prepare_params(w1, b1, w2, b2, compute_dtype=jnp.bfloat16):
    """One-time param prep (hoisted out of the per-call path):
       transpose to (in, out), pad output dim to 128 lanes, cast weights to
       bf16 for the MXU, keep biases f32 for the VPU/EUP path."""
    H, F = w1.shape
    O = w2.shape[0]
    O_pad = _round_up(max(O, LANE), LANE)

    w1_t = w1.T.astype(compute_dtype)                               # (F, H)
    b1_2d = b1.reshape(1, H).astype(jnp.float32)                    # (1, H)
    w2_pad = jnp.zeros((H, O_pad), compute_dtype).at[:, :O].set(
        w2.T.astype(compute_dtype))                                 # (H, O_pad)
    b2_pad = jnp.full((1, O_pad), _NEG_BIG, jnp.float32).at[0, :O].set(
        b2.astype(jnp.float32))                                     # (1, O_pad)
    return w1_t, b1_2d, w2_pad, b2_pad


@functools.partial(jax.jit, static_argnames=("out_size", "block_b"))
def survival_predictor_forward(x, w1_t, b1_2d, w2_pad, b2_pad,
                               *, out_size, block_b=512):
    """x: (B, input_size) f32. Params from prepare_params().
       Returns softmax probabilities (B, out_size), f32."""
    B, F = x.shape
    H = w1_t.shape[1]
    O_pad = w2_pad.shape[1]

    # Batch tile: multiple of 16 (bf16 sublane packing), capped at block_b.
    tb = min(block_b, _round_up(B, 16))
    grid_b = pl.cdiv(B, tb)
    B_pad = grid_b * tb

    x_c = x.astype(w1_t.dtype)
    if B_pad != B:
        x_c = jnp.pad(x_c, ((0, B_pad - B), (0, 0)))

    itemsize = jnp.dtype(w1_t.dtype).itemsize
    cost = pl.CostEstimate(
        flops=2 * B_pad * (F * H + H * O_pad),
        transcendentals=B_pad * O_pad,
        bytes_accessed=(B_pad * F * itemsize            # streamed x tiles
                        + F * H * itemsize              # resident W1
                        + H * O_pad * itemsize          # resident W2
                        + (H + O_pad) * 4               # biases
                        + B_pad * O_pad * 4),           # f32 output
    )

    out = pl.pallas_call(
        mlp_kernel,
        out_shape=jax.ShapeDtypeStruct((B_pad, O_pad), jnp.float32),
        grid_spec=pltpu.PrefetchScalarGridSpec(
            num_scalar_prefetch=0,
            grid=(grid_b,),
            in_specs=[
                pl.BlockSpec((tb, F), lambda i: (i, 0)),       # x: batch-tiled
                pl.BlockSpec((F, H), lambda i: (0, 0)),        # W1: resident
                pl.BlockSpec((1, H), lambda i: (0, 0)),        # b1: resident
                pl.BlockSpec((H, O_pad), lambda i: (0, 0)),    # W2: resident
                pl.BlockSpec((1, O_pad), lambda i: (0, 0)),    # b2: resident
            ],
            out_specs=pl.BlockSpec((tb, O_pad), lambda i: (i, 0)),
        ),
        compiler_params=pltpu.CompilerParams(
            dimension_semantics=("parallel",)),
        cost_estimate=cost,
    )(x_c, w1_t, b1_2d, w2_pad, b2_pad)

    # Drop batch padding and the padded softmax lanes (free XLA slice).
    return out[:B, :out_size]


def init_params(key, input_size, hidden_size, output_size):
    """Deterministic init mimicking PyTorch Linear default:
       U(-1/sqrt(fan_in), 1/sqrt(fan_in))."""
    k1, k2, k3, k4 = jax.random.split(key, 4)
    bound1 = 1.0 / (input_size ** 0.5)
    bound2 = 1.0 / (hidden_size ** 0.5)
    w1 = jax.random.uniform(k1, (hidden_size, input_size), jnp.float32, -bound1, bound1)
    b1 = jax.random.uniform(k2, (hidden_size,), jnp.float32, -bound1, bound1)
    w2 = jax.random.uniform(k3, (output_size, hidden_size), jnp.float32, -bound2, bound2)
    b2 = jax.random.uniform(k4, (output_size,), jnp.float32, -bound2, bound2)
    return w1, b1, w2, b2


if __name__ == "__main__":
    # Small shapes consistent with the module's forward: x is (batch, input_size).
    batch, input_size, hidden_size, output_size = 8, 16, 32, 4

    key = jax.random.PRNGKey(0)
    kx, kp = jax.random.split(key)
    x = jax.random.normal(kx, (batch, input_size), jnp.float32)
    w1, b1, w2, b2 = init_params(kp, input_size, hidden_size, output_size)

    # One-time parameter prep (transpose / pad / bf16 cast).
    w1_t, b1_2d, w2_pad, b2_pad = prepare_params(w1, b1, w2, b2)

    out = survival_predictor_forward(x, w1_t, b1_2d, w2_pad, b2_pad,
                                     out_size=output_size)
    out = jax.block_until_ready(out)

    # Reference check in plain f32 JAX (same math as the PyTorch module).
    h_ref = jnp.maximum(x @ w1.T + b1, 0.0)
    z_ref = h_ref @ w2.T + b2
    ref = jax.nn.softmax(z_ref, axis=-1)

    assert out.shape == (batch, output_size)
    # bf16 matmul inputs + approx reciprocal -> relaxed tolerance vs f32 ref.
    assert jnp.allclose(out, ref, atol=2e-2), "mismatch vs reference"
    assert jnp.allclose(jnp.sum(out, axis=-1), 1.0, atol=1e-2)

    print("KERNEL_OK")
</pallas_src>

<mosaic_0001>
module attributes {stable_mosaic.version = 11 : i64} {
  func.func @mlp_kernel(%arg0: i32, %arg1: memref<16x16xbf16, #tpu.memory_space<vmem>>, %arg2: memref<16x32xbf16, #tpu.memory_space<vmem>>, %arg3: memref<1x32xf32, #tpu.memory_space<vmem>>, %arg4: memref<32x128xbf16, #tpu.memory_space<vmem>>, %arg5: memref<1x128xf32, #tpu.memory_space<vmem>>, %arg6: memref<16x128xf32, #tpu.memory_space<vmem>>) attributes {dimension_semantics = [#tpu.dimension_semantics<parallel>], iteration_bounds = array<i64: 1>, scalar_prefetch = 0 : i64, scratch_operands = 0 : i64, tpu.core_type = #tpu.core_type<tc>, window_params = [{transform_indices = @transform_0, window_bounds = array<i64: 16, 16>}, {pipeline_mode = #tpu.pipeline_mode<synchronous>, transform_indices = @transform_1, window_bounds = array<i64: 16, 32>}, {pipeline_mode = #tpu.pipeline_mode<synchronous>, transform_indices = @transform_2, window_bounds = array<i64: 1, 32>}, {pipeline_mode = #tpu.pipeline_mode<synchronous>, transform_indices = @transform_3, window_bounds = array<i64: 32, 128>}, {pipeline_mode = #tpu.pipeline_mode<synchronous>, transform_indices = @transform_4, window_bounds = array<i64: 1, 128>}, {transform_indices = @transform_5, window_bounds = array<i64: 16, 128>}]} {
    %c0 = arith.constant 0 : index
    %c0_0 = arith.constant 0 : index
    %0 = vector.load %arg1[%c0, %c0_0] : memref<16x16xbf16, #tpu.memory_space<vmem>>, vector<16x16xbf16>
    %c0_1 = arith.constant 0 : index
    %c0_2 = arith.constant 0 : index
    %1 = vector.load %arg2[%c0_1, %c0_2] : memref<16x32xbf16, #tpu.memory_space<vmem>>, vector<16x32xbf16>
    %cst = arith.constant dense<0.000000e+00> : vector<16x32xf32>
    %2 = tpu.matmul %0, %1, %cst {dimension_numbers = #tpu.dot_dimension_numbers<[1], [0], [0], [1], [0, 0, 1, 1], [], []>} : vector<16x16xbf16>, vector<16x32xbf16>, vector<16x32xf32> -> vector<16x32xf32>
    %c0_3 = arith.constant 0 : index
    %c0_4 = arith.constant 0 : index
    %3 = vector.load %arg3[%c0_3, %c0_4] : memref<1x32xf32, #tpu.memory_space<vmem>>, vector<1x32xf32>
    %4 = vector.broadcast %3 : vector<1x32xf32> to vector<16x32xf32>
    %5 = arith.addf %2, %4 : vector<16x32xf32>
    %cst_5 = arith.constant 0.000000e+00 : f32
    %6 = vector.broadcast %cst_5 : f32 to vector<16x32xf32>
    %7 = arith.maximumf %5, %6 : vector<16x32xf32>
    %8 = arith.truncf %7 : vector<16x32xf32> to vector<16x32xbf16>
    %c0_6 = arith.constant 0 : index
    %c0_7 = arith.constant 0 : index
    %9 = vector.load %arg4[%c0_6, %c0_7] : memref<32x128xbf16, #tpu.memory_space<vmem>>, vector<32x128xbf16>
    %cst_8 = arith.constant dense<0.000000e+00> : vector<16x128xf32>
    %10 = tpu.matmul %8, %9, %cst_8 {dimension_numbers = #tpu.dot_dimension_numbers<[1], [0], [0], [1], [0, 0, 1, 1], [], []>} : vector<16x32xbf16>, vector<32x128xbf16>, vector<16x128xf32> -> vector<16x128xf32>
    %c0_9 = arith.constant 0 : index
    %c0_10 = arith.constant 0 : index
    %11 = vector.load %arg5[%c0_9, %c0_10] : memref<1x128xf32, #tpu.memory_space<vmem>>, vector<1x128xf32>
    %12 = vector.broadcast %11 : vector<1x128xf32> to vector<16x128xf32>
    %13 = arith.addf %10, %12 : vector<16x128xf32>
    %cst_11 = arith.constant dense<0xFF800000> : vector<16xf32>
    %14 = vector.multi_reduction <maximumf>, %13, %cst_11 [1] : vector<16x128xf32> to vector<16xf32>
    %15 = vector.shape_cast %14 : vector<16xf32> to vector<16x1xf32>
    %16 = vector.broadcast %15 : vector<16x1xf32> to vector<16x128xf32>
    %17 = arith.subf %13, %16 : vector<16x128xf32>
    %18 = math.exp %17 : vector<16x128xf32>
    %cst_12 = arith.constant dense<0.000000e+00> : vector<16xf32>
    %19 = vector.multi_reduction <add>, %18, %cst_12 [1] : vector<16x128xf32> to vector<16xf32>
    %20 = vector.shape_cast %19 : vector<16xf32> to vector<16x1xf32>
    %21 = tpu.reciprocal %20 {approx = true} : vector<16x1xf32> -> vector<16x1xf32>
    %22 = vector.broadcast %21 : vector<16x1xf32> to vector<16x128xf32>
    %23 = arith.mulf %18, %22 : vector<16x128xf32>
    %c0_13 = arith.constant 0 : index
    %c0_14 = arith.constant 0 : index
    %24 = vector.load %arg6[%c0_13, %c0_14] : memref<16x128xf32, #tpu.memory_space<vmem>>, vector<16x128xf32>
    tpu.vector_store %arg6[%c0_13, %c0_14], %23 {strides = array<i32>} : memref<16x128xf32, #tpu.memory_space<vmem>>, vector<16x128xf32>,
    return
  }
  func.func @transform_0(%arg0: i32) -> (i32, i32) {
    %c0_i32 = arith.constant 0 : i32
    %c0_i32_0 = arith.constant 0 : i32
    return %arg0, %c0_i32 : i32, i32
  }
  func.func @transform_1(%arg0: i32) -> (i32, i32) {
    %c0_i32 = arith.constant 0 : i32
    %c0_i32_0 = arith.constant 0 : i32
    %c0_i32_1 = arith.constant 0 : i32
    return %c0_i32, %c0_i32_0 : i32, i32
  }
  func.func @transform_2(%arg0: i32) -> (i32, i32) {
    %c0_i32 = arith.constant 0 : i32
    %c0_i32_0 = arith.constant 0 : i32
    %c0_i32_1 = arith.constant 0 : i32
    return %c0_i32, %c0_i32_0 : i32, i32
  }
  func.func @transform_3(%arg0: i32) -> (i32, i32) {
    %c0_i32 = arith.constant 0 : i32
    %c0_i32_0 = arith.constant 0 : i32
    %c0_i32_1 = arith.constant 0 : i32
    return %c0_i32, %c0_i32_0 : i32, i32
  }
  func.func @transform_4(%arg0: i32) -> (i32, i32) {
    %c0_i32 = arith.constant 0 : i32
    %c0_i32_0 = arith.constant 0 : i32
    %c0_i32_1 = arith.constant 0 : i32
    return %c0_i32, %c0_i32_0 : i32, i32
  }
  func.func @transform_5(%arg0: i32) -> (i32, i32) {
    %c0_i32 = arith.constant 0 : i32
    %c0_i32_0 = arith.constant 0 : i32
    return %arg0, %c0_i32 : i32, i32
  }
}

</mosaic_0001>

<bundles_post_ra>
// kernel: survival_predictor_forward.1
= control target key start
LH: loop header
LB: loop body
LE: loop exit
PB: predicated region body
PF: predicated region fallthrough
CT: control target
= control target key end

     0   :  { %vm40_vm0 = vcmask 130048   ;;  %vm81_vm1 = vcmask 261120   ;;  %s209_s1 = inlined_call_operand.vmem [shape: bf16[16,32], index: 1, kind: input, shape index: {}]   ;;  %s210_s0 = inlined_call_operand.vmem [shape: bf16[16,16], index: 0, kind: input, shape index: {}]   ;;  %s211_s2 = inlined_call_operand.vmem [shape: f32[1,32], index: 2, kind: input, shape index: {}]   ;;  %s212_s4 = inlined_call_operand.vmem [shape: f32[1,128], index: 4, kind: input, shape index: {}]   ;;  %s213_s3 = inlined_call_operand.vmem [shape: bf16[32,128], index: 3, kind: input, shape index: {}]   ;;  %s214_s5 = inlined_call_operand.vmem [shape: f32[16,128], index: 5, kind: output, shape index: {}]  }
   0x1   :  { %v142_v0 = vld [vmem:[%s209_s1] sm:$0xff]  ;;  %v144_v2 = vld [vmem:[%s213_s3 + $0x8] sm:$0xff] }
   0x2   :  { %v141_v1 = vld [vmem:[%s210_s0] sm:$0xff]  ;;  %51 = vmatpush.bf16.msra.mxu0 %v142_v0  ;;  %91 = vmatpush.bf16.msra.mxu1 %v144_v2 }
   0x3   :  { %v143_v3 = vld [vmem:[%s213_s3] sm:$0xff] }
   0x4   :  { %v145_v5 = vld [vmem:[%s211_s2] ss:$0 sm:$0xff] }
   0x5   :  { %131 = vmatmul.msk.bf16.vlgmr.msra.gmra.mxu0 %vm40_vm0, %v141_v1  ;;  %v146_v12 = vld [vmem:[%s212_s4] ss:$0 sm:$0xff] }
   0x6   :  { %92 = vmatpush.bf16.msra.mxu1 %v143_v3 }
  0x82   :  { %v53_v4 = vpop.f32.mrf.mxu0 }
  0x83   :  { %v54_v6 = vadd.f32 %v145_v5, %v53_v4 }
  0x85   :  { %v58_v9 = vmax.f32 %v54_v6, 0.0 }
  0x8a   :  { %v55_v7 = vpop.f32.mrf.mxu0 }
  0x8b   :  { %v56_v8 = vadd.f32 %v145_v5, %v55_v7 }
  0x8d   :  { %v59_v10 = vmax.f32 %v56_v8, 0.0 }
  0x8f   :  { %v60_v11 = vpack.c.bf16 %v59_v10, %v58_v9 }
  0x91   :  { %140 = vmatmul.msk.bf16.vlgmr.msra.gmra.mxu1 %vm81_vm1, %v60_v11 }
 0x10e   :  { %v94_v13 = vpop.f32.mrf.mxu1 }
 0x10f   :  { %v95_v14 = vadd.f32 %v146_v12, %v94_v13 }
 0x111   :  { %99 = vmax.xlane.f32.xlu0 %v95_v14 }
 0x116   :  { %v96_v15 = vpop.f32.mrf.mxu1 }
 0x117   :  { %v97_v16 = vadd.f32 %v146_v12, %v96_v15 }
 0x119   :  { %101 = vmax.xlane.f32.xlu0 %v97_v16 }
 0x184   :  { %v100_v17 = vpop.xlane.xlu0 %99 }
 0x185   :  { %v103_v18 = vsub.f32 %v95_v14, %v100_v17 }
 0x187   :  { %v105_v19 = vmul.f32 1.442695, %v103_v18 }
 0x189   :  { %147 = vpow2.f32 %v105_v19 }
 0x18c   :  { %v102_v20 = vpop.xlane.xlu0 %101 }
 0x18d   :  { %v104_v21 = vsub.f32 %v97_v16, %v102_v20 }
 0x18f   :  { %v148_v22 = vpop.eup %147  ;;  %v107_v23 = vmul.f32 1.442695, %v104_v21 }
 0x190   :  { %109 = vadd.xlane.f32.xlu1 %v148_v22 }
 0x191   :  { %149 = vpow2.f32 %v107_v23 }
 0x197   :  { %v150_v24 = vpop.eup %149 }
 0x198   :  { %111 = vadd.xlane.f32.xlu1 %v150_v24 }
 0x203   :  { %v110_v25 = vpop.xlane.xlu1 %109 }
 0x204   :  { %151 = vrcp.f32 %v110_v25 }
 0x20a   :  { %v152_v26 = vpop.eup %151 }
 0x20b   :  { %v115_v27 = vmul.f32 %v152_v26, %v148_v22  ;;  %v112_v28 = vpop.xlane.xlu1 %111 }
 0x20c   :  { %153 = vrcp.f32 %v112_v28 }
 0x20d   :  { %117 = vst [vmem:[%s214_s5] sm:$0xff] %v115_v27 }
 0x212   :  { %v154_v29 = vpop.eup %153 }
 0x213   :  { %v116_v30 = vmul.f32 %v154_v29, %v150_v24 }
 0x215   :  { %118 = vst [vmem:[%s214_s5 + $0x8] sm:$0xff] %v116_v30 }

</bundles_post_ra>
